<compile_context>
chip_gen: v6e
topology: v6e:2x2x1
jax: 0.10.0
libtpu: 0.0.40
codegen_flags: <defaults>
</compile_context>

<pallas_src>
import functools

import jax
import jax.numpy as jnp
from jax.experimental import pallas as pl
from jax.experimental.pallas import tpu as pltpu


def _round_up(x, m):
    return (x + m - 1) // m * m


def _embedding_kernel(ids_ref, table_ref, out_ref, *, compute_dtype):
    # ids_ref:   (TN, 1)  int32 token ids for this token block
    # table_ref: (VK, D)  embedding-table chunk (vocab rows [k*VK, (k+1)*VK))
    # out_ref:   (TN, D)  output block, resident across the vocab axis
    k = pl.program_id(1)

    ids = ids_ref[...]                                   # (TN, 1)
    tn = ids.shape[0]
    vk = table_ref.shape[0]

    # Global vocab indices covered by this chunk.
    iota = k * vk + jax.lax.broadcasted_iota(jnp.int32, (tn, vk), 1)
    onehot = (iota == ids).astype(compute_dtype)          # exact 0/1 values

    partial = jnp.dot(
        onehot,
        table_ref[...].astype(compute_dtype),
        preferred_element_type=jnp.float32,
    )

    @pl.when(k == 0)
    def _():
        out_ref[...] = jnp.zeros_like(out_ref)

    out_ref[...] += partial.astype(out_ref.dtype)


@functools.partial(
    jax.jit, static_argnames=("block_tokens", "vocab_block", "compute_dtype")
)
def word_embedding_forward(
    x,
    table,
    *,
    block_tokens=128,     # sweep: 128 (v5e) / 256 (v6e, v7x)
    vocab_block=512,      # sweep: 512-2048, multiple of 128
    compute_dtype=jnp.bfloat16,
):
    """Pallas equivalent of WordEmbedding.forward (dropout p=0.0 -> identity)."""
    b, s = x.shape
    vp1, d = table.shape
    n = b * s

    # ---- token tiling (avoid pad/slice copy when possible) ----
    tn = min(block_tokens, _round_up(n, 8))
    ids = x.reshape(n, 1).astype(jnp.int32)
    pad_n = (-n) % tn
    if pad_n:
        # Pad with the padding index: its table row is zero and the padded
        # rows are sliced off below, so this is harmless.
        ids = jnp.concatenate(
            [ids, jnp.full((pad_n, 1), vp1 - 1, dtype=jnp.int32)], axis=0
        )
    n_padded = n + pad_n

    # ---- vocab tiling (keeps VMEM flat for large tables) ----
    vk = min(vocab_block, _round_up(vp1, 8))
    pad_v = (-vp1) % vk
    if pad_v:
        # Zero rows at vocab indices >= vp1: never selected by any valid id.
        table = jnp.concatenate(
            [table, jnp.zeros((pad_v, d), dtype=table.dtype)], axis=0
        )
    v_padded = vp1 + pad_v

    grid = (n_padded // tn, v_padded // vk)

    cost = pl.CostEstimate(
        flops=2 * n_padded * v_padded * d,
        transcendentals=0,
        bytes_accessed=(
            n_padded * 4                                          # ids
            + grid[0] * v_padded * d * table.dtype.itemsize       # table re-reads
            + n_padded * d * table.dtype.itemsize                 # output
        ),
    )

    out = pl.pallas_call(
        functools.partial(_embedding_kernel, compute_dtype=compute_dtype),
        out_shape=jax.ShapeDtypeStruct((n_padded, d), table.dtype),
        grid_spec=pltpu.PrefetchScalarGridSpec(
            num_scalar_prefetch=0,
            grid=grid,
            in_specs=[
                pl.BlockSpec((tn, 1), lambda i, k: (i, 0)),
                pl.BlockSpec((vk, d), lambda i, k: (k, 0)),
            ],
            out_specs=pl.BlockSpec((tn, d), lambda i, k: (i, 0)),
        ),
        compiler_params=pltpu.CompilerParams(
            dimension_semantics=("parallel", "arbitrary"),
        ),
        cost_estimate=cost,
    )(ids, table)

    if pad_n:
        out = out[:n]
    return out.reshape(b, s, d)


if __name__ == "__main__":
    # Module hyper-params (small, synthetic).
    ntoken = 255          # vocab size; padding idx = ntoken -> table has 256 rows
    dim = 128             # embedding dim (lane-aligned)
    batch, seq = 2, 8

    key = jax.random.PRNGKey(0)
    k_w, k_x = jax.random.split(key)

    # Deterministic parameter init: N(0,1) like nn.Embedding default, with the
    # padding row (index ntoken) zeroed, matching padding_idx=ntoken.
    table = jax.random.normal(k_w, (ntoken + 1, dim), dtype=jnp.float32)
    table = table.at[ntoken].set(0.0)

    # Token ids in [0, ntoken] (inclusive, so padding tokens may appear).
    x = jax.random.randint(k_x, (batch, seq), 0, ntoken + 1, dtype=jnp.int32)

    # --- default (bf16 MXU feed, f32 accumulation) ---
    out = word_embedding_forward(x, table)
    out = jax.block_until_ready(out)
    assert out.shape == (batch, seq, dim)
    # One-hot is exact; the only rounding is the bf16 cast of the table rows.
    ref_bf16 = jnp.take(
        table.astype(jnp.bfloat16).astype(jnp.float32), x, axis=0
    )
    assert jnp.allclose(out, ref_bf16, atol=1e-6), "bf16-path mismatch"

    # --- exact f32 path ---
    out_f32 = word_embedding_forward(x, table, compute_dtype=jnp.float32)
    out_f32 = jax.block_until_ready(out_f32)
    ref_f32 = jnp.take(table, x, axis=0)
    assert jnp.allclose(out_f32, ref_f32, atol=1e-5), "f32-path mismatch"

    print("KERNEL_OK")
</pallas_src>

<mosaic_0001>
module attributes {stable_mosaic.version = 11 : i64} {
  func.func @_embedding_kernel(%arg0: i32, %arg1: i32, %arg2: memref<16x1xi32, #tpu.memory_space<vmem>>, %arg3: memref<256x128xf32, #tpu.memory_space<vmem>>, %arg4: memref<16x128xf32, #tpu.memory_space<vmem>>) attributes {dimension_semantics = [#tpu.dimension_semantics<parallel>, #tpu.dimension_semantics<arbitrary>], iteration_bounds = array<i64: 1, 1>, scalar_prefetch = 0 : i64, scratch_operands = 0 : i64, tpu.core_type = #tpu.core_type<tc>, window_params = [{transform_indices = @transform_0, window_bounds = array<i64: 16, 1>}, {transform_indices = @transform_1, window_bounds = array<i64: 256, 128>}, {transform_indices = @transform_2, window_bounds = array<i64: 16, 128>}]} {
    %c0 = arith.constant 0 : index
    %c0_0 = arith.constant 0 : index
    %0 = vector.load %arg2[%c0, %c0_0] : memref<16x1xi32, #tpu.memory_space<vmem>>, vector<16x1xi32>
    %c256_i32 = arith.constant 256 : i32
    %1 = arith.muli %arg1, %c256_i32 : i32
    %2 = tpu.iota {dimensions = array<i32: 1>} : vector<16x256xi32>
    %3 = vector.broadcast %1 : i32 to vector<16x256xi32>
    %4 = arith.addi %3, %2 : vector<16x256xi32>
    %5 = vector.broadcast %0 : vector<16x1xi32> to vector<16x256xi32>
    %6 = arith.cmpi eq, %4, %5 : vector<16x256xi32>
    %7 = arith.extui %6 : vector<16x256xi1> to vector<16x256xi32>
    %8 = arith.sitofp %7 : vector<16x256xi32> to vector<16x256xf32>
    %9 = arith.truncf %8 : vector<16x256xf32> to vector<16x256xbf16>
    %c0_1 = arith.constant 0 : index
    %c0_2 = arith.constant 0 : index
    %10 = vector.load %arg3[%c0_1, %c0_2] : memref<256x128xf32, #tpu.memory_space<vmem>>, vector<256x128xf32>
    %11 = arith.truncf %10 : vector<256x128xf32> to vector<256x128xbf16>
    %cst = arith.constant dense<0.000000e+00> : vector<16x128xf32>
    %12 = tpu.matmul %9, %11, %cst {dimension_numbers = #tpu.dot_dimension_numbers<[1], [0], [0], [1], [0, 0, 1, 1], [], []>} : vector<16x256xbf16>, vector<256x128xbf16>, vector<16x128xf32> -> vector<16x128xf32>
    %c0_i32 = arith.constant 0 : i32
    %13 = arith.cmpi eq, %arg1, %c0_i32 : i32
    %14 = arith.extui %13 : i1 to i32
    %c0_i32_3 = arith.constant 0 : i32
    %15 = arith.cmpi ne, %14, %c0_i32_3 : i32
    scf.if %15 {
      %cst_8 = arith.constant 0.000000e+00 : f32
      %19 = vector.broadcast %cst_8 : f32 to vector<16x128xf32>
      %c0_9 = arith.constant 0 : index
      %c0_10 = arith.constant 0 : index
      %20 = vector.load %arg4[%c0_9, %c0_10] : memref<16x128xf32, #tpu.memory_space<vmem>>, vector<16x128xf32>
      tpu.vector_store %arg4[%c0_9, %c0_10], %19 {strides = array<i32>} : memref<16x128xf32, #tpu.memory_space<vmem>>, vector<16x128xf32>,
    } else {
    }
    %c0_4 = arith.constant 0 : index
    %c0_5 = arith.constant 0 : index
    %16 = vector.load %arg4[%c0_4, %c0_5] : memref<16x128xf32, #tpu.memory_space<vmem>>, vector<16x128xf32>
    %17 = arith.addf %16, %12 : vector<16x128xf32>
    %c0_6 = arith.constant 0 : index
    %c0_7 = arith.constant 0 : index
    %18 = vector.load %arg4[%c0_6, %c0_7] : memref<16x128xf32, #tpu.memory_space<vmem>>, vector<16x128xf32>
    tpu.vector_store %arg4[%c0_6, %c0_7], %17 {strides = array<i32>} : memref<16x128xf32, #tpu.memory_space<vmem>>, vector<16x128xf32>,
    return
  }
  func.func @transform_0(%arg0: i32, %arg1: i32) -> (i32, i32) {
    %c0_i32 = arith.constant 0 : i32
    %c0_i32_0 = arith.constant 0 : i32
    return %arg0, %c0_i32 : i32, i32
  }
  func.func @transform_1(%arg0: i32, %arg1: i32) -> (i32, i32) {
    %c0_i32 = arith.constant 0 : i32
    %c0_i32_0 = arith.constant 0 : i32
    return %arg1, %c0_i32 : i32, i32
  }
  func.func @transform_2(%arg0: i32, %arg1: i32) -> (i32, i32) {
    %c0_i32 = arith.constant 0 : i32
    %c0_i32_0 = arith.constant 0 : i32
    return %arg0, %c0_i32 : i32, i32
  }
}

</mosaic_0001>

<bundles_post_ra>
// kernel: word_embedding_forward.1
= control target key start
LH: loop header
LB: loop body
LE: loop exit
PB: predicated region body
PF: predicated region fallthrough
CT: control target
= control target key end

     0   :  { %7 = vsyncpa [#allocation3], 0  ;;  %s295_s0 = inlined_call_operand.vmem [shape: s32[16,1], index: 0, kind: input, shape index: {}]   ;;  %s296_s1 = inlined_call_operand.hbm [shape: f32[256,128], index: 1, kind: input, shape index: {}]   ;;  %s297_s2 = inlined_call_operand.hbm [shape: f32[16,128], index: 2, kind: output, shape index: {}]  }
   0x1   :  { %8 = vsyncpa [#allocation4], 0  ;;  %s256_s9 = smov [#allocation2]  }
   0x2   :  { %s16_s10 = sshll.u32 %s256_s9, 4  ;;  %s17_s10 = int_to_ptr.vmem [resolvable:$true] %s16_s10 }
   0x3   :  { %s220_s11 = scalar_lea.vmem %s17_s10, 4096  ;;  %p225_p1 = scmp.lt.s32.totalorder %s17_s10, %s17_s10 }
   0x4   :  { %p221_p0 = scmp.ne.s32.totalorder %s17_s10, %s220_s11  ;;  %p226_p2 = scmp.lt.s32.totalorder %s220_s11, %s220_s11 }
   0x6   :  { %p227_p3 = por %p226_p2, %p225_p1 }
   0x8   :  { %p228_p4 = pnand %p227_p3, %p221_p0 }
   0xa   :  { %231 = shalt.err (!%p228_p4)
}
   0xb   :  { %s257_s12 = smov 128   ;;  %s258_s13 = smov 8  }
   0xc   :  { %22 = dma.hbm_to_vmem [thread:$0]  %s296_s1, 4096, %s17_s10, [#allocation3], %s257_s12, %s257_s12, %s258_s13  }
   0xd   :  { %252 = dma.done.wait [#allocation3], 4096  }
   0xe   :  { %253 = vsyncadd [#allocation3], 4294963200  ;;  %v259_v0 = vmov 0   ;;  %v27_v1 = vld [vmem:[%s295_s0] sm:$0xff]  ;;  %v28_v2 = vld [vmem:[%s295_s0 + $0x8] sm:$0xff]  ;;  %v30_v51 = vlaneseq  ;;  %s261_s0 = smov [#allocation5]  }
   0xf   :  { %211 = vset.pattern.permute.xlu0 %v259_v0  ;;  %v86_v3 = vld [vmem:[#allocation2 + $0xf0] sm:$0xff]  ;;  %v87_v4 = vld [vmem:[#allocation2 + $0xf8] sm:$0xff]  ;;  %v84_v9 = vld [vmem:[#allocation2 + $0xe0] sm:$0xff]  ;;  %v260_v56 = vmov 1.0|1.0   ;;  %s162_s1 = sshll.u32 %s261_s0, 4  ;;  %s163_s1 = int_to_ptr.vmem [resolvable:$true] %s162_s1 }
  0x10   :  { %37 = vperm.xlu0 %211, %v27_v1   ;;  %v70_v5 = vld [vmem:[#allocation2 + $0x70] sm:$0xff]  ;;  %v71_v6 = vld [vmem:[#allocation2 + $0x78] sm:$0xff]  ;;  %v103_v7 = vpack.c.bf16 %v87_v4, %v86_v3  ;;  %v85_v10 = vld [vmem:[#allocation2 + $0xe8] sm:$0xff]  ;;  %v31_v52 = vand.u32 127, %v30_v51  ;;  %s232_s20 = scalar_lea.vmem %s163_s1, 256  ;;  %p237_p6 = scmp.lt.s32.totalorder %s163_s1, %s163_s1 }
  0x11   :  { %v95_v8 = vpack.c.bf16 %v71_v6, %v70_v5  ;;  %v68_v11 = vld [vmem:[#allocation2 + $0x60] sm:$0xff]  ;;  %v102_v12 = vpack.c.bf16 %v85_v10, %v84_v9  ;;  %v69_v13 = vld [vmem:[#allocation2 + $0x68] sm:$0xff]  ;;  %v82_v14 = vld [vmem:[#allocation2 + $0xd0] sm:$0xff]  ;;  %p233_p5 = scmp.ne.s32.totalorder %s163_s1, %s232_s20  ;;  %p238_p7 = scmp.lt.s32.totalorder %s232_s20, %s232_s20 }
  0x12   :  { %v83_v15 = vld [vmem:[#allocation2 + $0xd8] sm:$0xff]  ;;  %182 = vmatprep.subr.bf16.mxu0 %v103_v7  ;;  %v94_v16 = vpack.c.bf16 %v69_v13, %v68_v11  ;;  %v66_v18 = vld [vmem:[#allocation2 + $0x50] sm:$0xff]  ;;  %v80_v20 = vld [vmem:[#allocation2 + $0xc0] sm:$0xff]  ;;  %v32_v54 = vadd.s32 128, %v31_v52 }
  0x13   :  { %183 = vmatpush3.bf16.msra.mxu0 %v95_v8  ;;  %v101_v17 = vpack.c.bf16 %v83_v15, %v82_v14  ;;  %v67_v19 = vld [vmem:[#allocation2 + $0x58] sm:$0xff]  ;;  %v81_v21 = vld [vmem:[#allocation2 + $0xc8] sm:$0xff]  ;;  %v64_v24 = vld [vmem:[#allocation2 + $0x40] sm:$0xff]  ;;  %p239_p8 = por %p238_p7, %p237_p6 }
  0x14   :  { %40 = vperm.xlu0 %211, %v28_v2   ;;  %184 = vmatprep.subr.bf16.mxu0 %v102_v12  ;;  %v93_v22 = vpack.c.bf16 %v67_v19, %v66_v18  ;;  %v100_v23 = vpack.c.bf16 %v81_v21, %v80_v20  ;;  %v65_v25 = vld [vmem:[#allocation2 + $0x48] sm:$0xff]  ;;  %v78_v26 = vld [vmem:[#allocation2 + $0xb0] sm:$0xff]  ;;  %v79_v27 = vld [vmem:[#allocation2 + $0xb8] sm:$0xff] }
  0x15   :  { %v92_v28 = vpack.c.bf16 %v65_v25, %v64_v24  ;;  %v99_v29 = vpack.c.bf16 %v79_v27, %v78_v26  ;;  %v62_v30 = vld [vmem:[#allocation2 + $0x30] sm:$0xff]  ;;  %v63_v31 = vld [vmem:[#allocation2 + $0x38] sm:$0xff]  ;;  %v76_v32 = vld [vmem:[#allocation2 + $0xa0] sm:$0xff]  ;;  %p240_p9 = pnand %p239_p8, %p233_p5 }
  0x16   :  { %v77_v33 = vld [vmem:[#allocation2 + $0xa8] sm:$0xff]  ;;  %v91_v34 = vpack.c.bf16 %v63_v31, %v62_v30  ;;  %v60_v36 = vld [vmem:[#allocation2 + $0x20] sm:$0xff]  ;;  %v74_v38 = vld [vmem:[#allocation2 + $0x90] sm:$0xff] }
  0x17   :  { %185 = vmatpush3.bf16.msra.mxu0 %v94_v16  ;;  %v98_v35 = vpack.c.bf16 %v77_v33, %v76_v32  ;;  %v61_v37 = vld [vmem:[#allocation2 + $0x28] sm:$0xff]  ;;  %v75_v39 = vld [vmem:[#allocation2 + $0x98] sm:$0xff]  ;;  %v58_v42 = vld [vmem:[#allocation2 + $0x10] sm:$0xff] }
  0x18   :  { %186 = vmatprep.subr.bf16.mxu0 %v101_v17  ;;  %v90_v40 = vpack.c.bf16 %v61_v37, %v60_v36  ;;  %v97_v41 = vpack.c.bf16 %v75_v39, %v74_v38  ;;  %v59_v43 = vld [vmem:[#allocation2 + $0x18] sm:$0xff]  ;;  %v72_v44 = vld [vmem:[#allocation2 + $0x80] sm:$0xff]  ;;  %v73_v45 = vld [vmem:[#allocation2 + $0x88] sm:$0xff] }
  0x19   :  { %v89_v46 = vpack.c.bf16 %v59_v43, %v58_v42  ;;  %v96_v47 = vpack.c.bf16 %v73_v45, %v72_v44  ;;  %v56_v48 = vld [vmem:[#allocation2] sm:$0xff]  ;;  %v57_v49 = vld [vmem:[#allocation2 + $0x8] sm:$0xff] }
  0x1a   :  { %v88_v50 = vpack.c.bf16 %v57_v49, %v56_v48 }
  0x1b   :  { %187 = vmatpush3.bf16.msra.mxu0 %v93_v22 }
  0x1c   :  { %188 = vmatprep.subr.bf16.mxu0 %v100_v23 }
  0x1f   :  { %189 = vmatpush3.bf16.msra.mxu0 %v92_v28 }
  0x20   :  { %190 = vmatprep.subr.bf16.mxu0 %v99_v29 }
  0x23   :  { %191 = vmatpush3.bf16.msra.mxu0 %v91_v34 }
  0x24   :  { %192 = vmatprep.subr.bf16.mxu0 %v98_v35 }
  0x27   :  { %193 = vmatpush3.bf16.msra.mxu0 %v90_v40 }
  0x28   :  { %194 = vmatprep.subr.bf16.mxu0 %v97_v41 }
  0x2b   :  { %195 = vmatpush3.bf16.msra.mxu0 %v89_v46 }
  0x2c   :  { %196 = vmatprep.subr.bf16.mxu0 %v96_v47 }
  0x2f   :  { %197 = vmatpush3.bf16.msra.mxu0 %v88_v50 }
  0x8b   :  { %v38_v53 = vpop.permute.xlu0 %37 }
  0x8c   :  { %vm42_vm0 = vcmp.eq.s32.totalorder %v31_v52, %v38_v53  ;;  %vm43_vm4 = vcmp.eq.s32.totalorder %v32_v54, %v38_v53 }
  0x8f   :  { %v41_v55 = vpop.permute.xlu0 %40 }
  0x90   :  { %vm44_vm1 = vcmp.eq.s32.totalorder %v31_v52, %v41_v55  ;;  %vm45_vm2 = vcmp.eq.s32.totalorder %v32_v54, %v41_v55 }
  0x91   :  { %vm180_vm3 = vmpackc.low %vm44_vm1, %vm42_vm0 }
  0x92   :  { %vm178_vm5 = vmpackc.low %vm45_vm2, %vm43_vm4 }
  0x93   :  { %179 = vmatprep.mubr.msk.bf16.mxu0 %vm178_vm5, %v260_v56 }
  0x94   :  { %181 = vmatmul.mubr.msk.bf16.vlgmr.msra.gmra.mxu0 %vm180_vm3, %v260_v56 }
 0x154   :  { %v198_v57 = vpop.f32.mrf.mxu0 }
 0x156   :  { %v199_v58 = vpop.f32.mrf.mxu0 }
 0x157   :  { %v200_v59 = vadd.f32 %v199_v58, %v198_v57 }
 0x158   :  { %v201_v60 = vpop.f32.mrf.mxu0 }
 0x159   :  { %155 = vst [vmem:[#allocation5] sm:$0xff] %v200_v59 }
 0x15a   :  { %v202_v61 = vpop.f32.mrf.mxu0 }
 0x15b   :  { %v203_v62 = vadd.f32 %v202_v61, %v201_v60 }
 0x15d   :  { %156 = vst [vmem:[#allocation5 + $0x8] sm:$0xff] %v203_v62 }
 0x15e   :  { %243 = shalt.err (!%p240_p9)
}
 0x15f   :  { %168 = dma.vmem_to_hbm [thread:$0]  %s163_s1, 256, %s297_s2, [#allocation4], %s257_s12, %s257_s12, %s258_s13  }
 0x160   :  { %254 = dma.done.wait [#allocation4], 256  }
 0x161   :  { %255 = vsyncadd [#allocation4], 4294967040 }
 0x162   :  { %172 = vsyncpa [#allocation3], 1 }
 0x163   :  { %173 = vsyncpa [#allocation4], 1 }

</bundles_post_ra>
